<compile_context>
chip_gen: v7x
topology: tpu7x:2x2x1
jax: 0.10.0
libtpu: 0.0.40
codegen_flags: <defaults>
</compile_context>

<pallas_src>
import jax
import jax.numpy as jnp
from jax import lax
from jax.experimental import pallas as pl
from jax.experimental.pallas import tpu as pltpu

LANE = 128
_MXU_DTYPE = jnp.bfloat16          # MXU operand dtype; accumulation is always f32


def _round_up(v, m):
    return (int(v) + m - 1) // m * m


def _vmem_limit_bytes():
    # ~96 MiB on 128-MiB VMEM parts (v5e/v6e), ~48 MiB on 64-MiB parts (v7x).
    try:
        info = pltpu.get_tpu_info()
        cap = int(getattr(info, "vmem_capacity_bytes"))
    except Exception:
        cap = 64 * 1024 * 1024
    return min(cap * 3 // 4, 100 * 1024 * 1024)


_VMEM_LIMIT = _vmem_limit_bytes()


def _choose_tiles(n):
    """(row_tile, k_tile, n_pad).  Large K tiles amortize per-grid-step overhead;
    row tiling keeps >=2 destination tiles whenever possible so both v7x TCs work."""
    n_aligned = _round_up(max(int(n), 1), LANE)
    if n_aligned <= 2048:
        tile_k = n_aligned
        n_pad = n_aligned
    else:
        tile_k = 2048
        n_pad = _round_up(n_aligned, tile_k)
    tile_row = 128
    while (tile_row * 2 <= min(n_pad // 2, 512)) and (n_pad % (tile_row * 2) == 0):
        tile_row *= 2
    return tile_row, tile_k, n_pad


def _choose_edge_tile(e):
    return min(_round_up(max(int(e), 1), LANE), 512)


def _pad2(a, rows, cols):
    return jnp.pad(a, ((0, rows - a.shape[0]), (0, cols - a.shape[1])))


# ----------------------------------------------------------------------------
# Pallas kernels
# ----------------------------------------------------------------------------
def xw_stacked_kernel(x_ref, w_ref, h0_ref, r_ref):
    # [H0 | R] = X @ [W_init | W_root]: single 256-wide MXU matmul per row tile.
    hr = jnp.dot(x_ref[...], w_ref[...], preferred_element_type=jnp.float32)
    c = h0_ref.shape[1]
    h0_ref[...] = hr[:, :c].astype(h0_ref.dtype)
    r_ref[...] = hr[:, c:].astype(r_ref.dtype)


def arma_prop_kernel(nnz_ref, nzk_ref, a_ref, h0_ref, r_ref, b_ref, o_ref, acc_ref):
    # out[i] = ReLU( sum_{k in nz(i)} A[i,k] @ H0[k]  +  R[i] + bias )
    i = pl.program_id(0)
    j = pl.program_id(1)

    @pl.when(j == 0)
    def _init():
        acc_ref[...] = jnp.zeros_like(acc_ref)

    # Padded j steps (j >= nnz[i]) re-present the previous, deduped A/H0 blocks:
    # no DMA was issued for them, and the MXU work is skipped here.
    @pl.when(j < nnz_ref[i])
    def _accum():
        acc_ref[...] += jnp.dot(
            a_ref[...], h0_ref[...], preferred_element_type=jnp.float32
        )

    @pl.when(j == pl.num_programs(1) - 1)
    def _epilogue():
        # f32 accumulator kept in VMEM scratch because the output itself is bf16.
        o_ref[...] = jnp.maximum(
            acc_ref[...] + r_ref[...] + b_ref[...], 0.0
        ).astype(o_ref.dtype)


def edge_mlp_kernel(xs_ref, xd_ref, w1s_ref, w1d_ref, b1_ref, w2r_ref, o_ref):
    # score = Linear(4C -> 1)( ReLU( x_src @ W1a + x_dst @ W1b + b1 ) )    (b2 on host)
    h = jnp.dot(xs_ref[...], w1s_ref[...], preferred_element_type=jnp.float32)
    h = h + jnp.dot(xd_ref[...], w1d_ref[...], preferred_element_type=jnp.float32)
    h = jnp.maximum(h + b1_ref[...], 0.0)
    # 1-wide projection as (1,H).(TE,H)^T -> (1,TE): lane-dense output slab,
    # avoids an (E,1) masked store and a 1-column MXU matmul.  Kept in f32 (tiny).
    score = lax.dot_general(
        w2r_ref[...], h,
        dimension_numbers=(((1,), (1,)), ((), ())),
        preferred_element_type=jnp.float32,
    )
    o_ref[...] = score.reshape(o_ref.shape)


# ----------------------------------------------------------------------------
# Kernel wrappers
# ----------------------------------------------------------------------------
def xw_stacked(x_bf16, w_stacked, c_pad, tile_row):
    n_pad, cin_pad = x_bf16.shape
    ni = n_pad // tile_row
    return pl.pallas_call(
        xw_stacked_kernel,
        out_shape=(jax.ShapeDtypeStruct((n_pad, c_pad), _MXU_DTYPE),
                   jax.ShapeDtypeStruct((n_pad, c_pad), jnp.float32)),
        grid=(ni,),
        in_specs=[
            pl.BlockSpec((tile_row, cin_pad), lambda i: (i, 0)),
            pl.BlockSpec((cin_pad, 2 * c_pad), lambda i: (0, 0)),
        ],
        out_specs=(pl.BlockSpec((tile_row, c_pad), lambda i: (i, 0)),
                   pl.BlockSpec((tile_row, c_pad), lambda i: (i, 0))),
        compiler_params=pltpu.CompilerParams(
            dimension_semantics=("parallel",), vmem_limit_bytes=_VMEM_LIMIT),
        cost_estimate=pl.CostEstimate(
            flops=4 * n_pad * cin_pad * c_pad,
            transcendentals=0,
            bytes_accessed=2 * n_pad * cin_pad + 4 * cin_pad * c_pad
            + 2 * n_pad * c_pad + 4 * n_pad * c_pad),
    )(x_bf16, w_stacked)


def arma_conv(a_bf16, nnz, nzk_flat, max_nnz, x_bf16, w_stacked, bias,
              tile_row, tile_k):
    """ARMAConv (1 stack, 1 layer, act=ReLU): ReLU(A @ (X@W_init) + X@W_root + b)."""
    n_pad = x_bf16.shape[0]
    c_pad = bias.shape[1]
    ni = n_pad // tile_row

    # Pre-pass: [H0 | R] in one stacked matmul (hoisted out of the K loop).
    h0, r = xw_stacked(x_bf16, w_stacked, c_pad, tile_row)

    # Data-dependent K axis: only nonzero adjacency tiles are fetched/compute.
    def a_map(i, j, nr, kr, _m=max_nnz):
        return (i, kr[i * _m + j])

    def h0_map(i, j, nr, kr, _m=max_nnz):
        return (kr[i * _m + j], 0)

    grid_spec = pltpu.PrefetchScalarGridSpec(
        num_scalar_prefetch=2,
        grid=(ni, max_nnz),
        in_specs=[
            pl.BlockSpec((tile_row, tile_k), a_map),                         # A tile (bf16)
            pl.BlockSpec((tile_k, c_pad), h0_map),                           # H0[nz] (bf16)
            pl.BlockSpec((tile_row, c_pad), lambda i, j, nr, kr: (i, 0)),    # R[i]   (f32)
            pl.BlockSpec((1, c_pad), lambda i, j, nr, kr: (0, 0)),           # bias
        ],
        out_specs=pl.BlockSpec((tile_row, c_pad), lambda i, j, nr, kr: (i, 0)),
        scratch_shapes=[pltpu.VMEM((tile_row, c_pad), jnp.float32)],
    )
    return pl.pallas_call(
        arma_prop_kernel,
        out_shape=jax.ShapeDtypeStruct((n_pad, c_pad), _MXU_DTYPE),
        grid_spec=grid_spec,
        compiler_params=pltpu.CompilerParams(
            dimension_semantics=("parallel", "arbitrary"),
            vmem_limit_bytes=_VMEM_LIMIT),
        cost_estimate=pl.CostEstimate(
            flops=2 * ni * max_nnz * tile_row * tile_k * c_pad,
            transcendentals=0,
            bytes_accessed=2 * ni * max_nnz * tile_row * tile_k
            + 2 * ni * max_nnz * tile_k * c_pad
            + 4 * n_pad * c_pad + 2 * n_pad * c_pad),
    )(nnz, nzk_flat, a_bf16, h0, r, bias)


def edge_mlp(xs, xd, w1s, w1d, b1, w2row, te):
    """Edge-score MLP, tiled over edges; returns a flat (E_pad,) score vector."""
    e_pad, c_pad = xs.shape
    h_pad = w1s.shape[1]
    ne = e_pad // te
    slab = pl.pallas_call(
        edge_mlp_kernel,
        out_shape=jax.ShapeDtypeStruct((ne, 1, te), jnp.float32),
        grid=(ne,),
        in_specs=[
            pl.BlockSpec((te, c_pad), lambda e: (e, 0)),
            pl.BlockSpec((te, c_pad), lambda e: (e, 0)),
            pl.BlockSpec((c_pad, h_pad), lambda e: (0, 0)),
            pl.BlockSpec((c_pad, h_pad), lambda e: (0, 0)),
            pl.BlockSpec((1, h_pad), lambda e: (0, 0)),
            pl.BlockSpec((1, h_pad), lambda e: (0, 0)),
        ],
        out_specs=pl.BlockSpec((1, 1, te), lambda e: (e, 0, 0)),
        compiler_params=pltpu.CompilerParams(
            dimension_semantics=("parallel",), vmem_limit_bytes=_VMEM_LIMIT),
        cost_estimate=pl.CostEstimate(
            flops=4 * e_pad * c_pad * h_pad + 2 * e_pad * h_pad,
            transcendentals=0,
            bytes_accessed=4 * e_pad * c_pad + 4 * e_pad),
    )(xs, xd, w1s, w1d, b1, w2row)
    return slab.reshape(-1)


# ----------------------------------------------------------------------------
# Plain-JAX glue (graph normalization, tile schedule, split, relabel)
# ----------------------------------------------------------------------------
def gcn_norm_dense_bf16(edge_index, edge_weight, num_nodes, n_pad):
    """GCN normalization (no self loops), densified in bf16: A[dst, src]."""
    row, col = edge_index[0], edge_index[1]          # source (j), target (i)
    deg = jnp.zeros((num_nodes,), jnp.float32).at[col].add(edge_weight)
    dinv = jnp.where(deg > 0, 1.0 / jnp.sqrt(deg), 0.0)
    norm = (dinv[row] * edge_weight * dinv[col]).astype(_MXU_DTYPE)
    return jnp.zeros((n_pad, n_pad), _MXU_DTYPE).at[col, row].add(norm)


def build_tile_schedule(edge_index, tile_row, tile_k, ni, nk):
    """Compacted per-row-tile list of nonzero source-tile indices (DMA-level skip)."""
    row, col = edge_index[0], edge_index[1]
    counts = jnp.zeros((ni, nk), jnp.int32).at[col // tile_row, row // tile_k].add(1)
    mask = counts > 0
    nnz = mask.sum(axis=1).astype(jnp.int32)
    order = jnp.argsort(jnp.logical_not(mask), axis=1).astype(jnp.int32)  # nonzero first
    max_nnz = max(int(nnz.max()), 1)
    last = order[jnp.arange(ni), jnp.maximum(nnz - 1, 0)][:, None]
    j_idx = jnp.arange(nk, dtype=jnp.int32)[None, :]
    # Pad trailing slots with the last valid index so the pipeline dedups the block.
    nzk = jnp.where(j_idx < nnz[:, None], order, last)[:, :max_nnz]
    return nnz, nzk.reshape(-1).astype(jnp.int32), max_nnz


def split_graph(edge_index, edge_attr, edge_score, ratio):
    # Single-graph top-k split by edge score (causal keeps the score as weight,
    # conf gets the negated score).
    e = edge_score.shape[0]
    k = int(ratio * e)
    perm = jnp.argsort(-edge_score)
    keep, drop = perm[:k], perm[k:]
    causal = (edge_index[:, keep], edge_attr[keep], edge_score[keep])
    conf = (edge_index[:, drop], edge_attr[drop], -edge_score[drop])
    return causal, conf


def relabel(x, edge_index, batch):
    num_nodes = x.shape[0]
    sub_nodes = jnp.unique(edge_index)
    x_sub = x[sub_nodes]
    batch_sub = batch[sub_nodes]
    node_idx = jnp.full((num_nodes,), -1, dtype=jnp.int32)
    node_idx = node_idx.at[sub_nodes].set(jnp.arange(sub_nodes.shape[0], dtype=jnp.int32))
    new_edge_index = node_idx[edge_index]
    return x_sub, new_edge_index, batch_sub, None


# ----------------------------------------------------------------------------
# Parameter init (deterministic, glorot-uniform)
# ----------------------------------------------------------------------------
def glorot(key, shape):
    fan_in, fan_out = shape[0], shape[1]
    lim = jnp.sqrt(6.0 / (fan_in + fan_out))
    return jax.random.uniform(key, shape, jnp.float32, -lim, lim)


def init_params(key, in_channels, channels):
    ks = jax.random.split(key, 8)
    return {
        "conv1_w_init": glorot(ks[0], (in_channels, channels)),
        "conv1_w_root": glorot(ks[1], (in_channels, channels)),
        "conv1_bias": jnp.zeros((1, channels), jnp.float32),
        "conv2_w_init": glorot(ks[2], (channels, channels)),
        "conv2_w_root": glorot(ks[3], (channels, channels)),
        "conv2_bias": jnp.zeros((1, channels), jnp.float32),
        "mlp_w1": glorot(ks[4], (channels * 2, channels * 4)),
        "mlp_b1": jnp.zeros((1, channels * 4), jnp.float32),
        "mlp_w2": glorot(ks[5], (channels * 4, 1)),
        "mlp_b2": jnp.zeros((1, 1), jnp.float32),
    }


# ----------------------------------------------------------------------------
# CausalAttNet forward
# ----------------------------------------------------------------------------
def causal_att_net_forward(params, x, edge_index, edge_attr, batch, ratio):
    edge_weight = edge_attr.reshape(-1).astype(jnp.float32)   # data.edge_attr.view(-1)
    n, in_ch = x.shape
    c = params["conv1_w_init"].shape[1]

    tile_row, tile_k, n_pad = _choose_tiles(n)
    cin_pad = _round_up(in_ch, LANE)
    c_pad = _round_up(c, LANE)
    h_pad_dim = _round_up(4 * c, LANE)
    ni, nk = n_pad // tile_row, n_pad // tile_k

    # Dense normalized adjacency (bf16) + compacted nonzero-tile schedule.
    a = gcn_norm_dense_bf16(edge_index, edge_weight, n, n_pad)
    nnz, nzk_flat, max_nnz = build_tile_schedule(edge_index, tile_row, tile_k, ni, nk)

    # bf16 MXU operands everywhere; accumulation stays f32 inside the kernels.
    x_pad = _pad2(x.astype(_MXU_DTYPE), n_pad, cin_pad)
    w1 = jnp.concatenate(
        [_pad2(params["conv1_w_init"], cin_pad, c_pad),
         _pad2(params["conv1_w_root"], cin_pad, c_pad)], axis=1).astype(_MXU_DTYPE)
    b1c = _pad2(params["conv1_bias"], 1, c_pad)
    w2 = jnp.concatenate(
        [_pad2(params["conv2_w_init"], c_pad, c_pad),
         _pad2(params["conv2_w_root"], c_pad, c_pad)], axis=1).astype(_MXU_DTYPE)
    b2c = _pad2(params["conv2_bias"], 1, c_pad)

    # conv1 -> conv2 (the extra F.relu is idempotent: ARMAConv already applies ReLU).
    h1 = arma_conv(a, nnz, nzk_flat, max_nnz, x_pad, w1, b1c, tile_row, tile_k)
    h2 = arma_conv(a, nnz, nzk_flat, max_nnz, h1, w2, b2c, tile_row, tile_k)

    # Edge scores: first Linear split into src/dst halves so no (E, 2C) concat is
    # materialized; gathered edge features stay bf16.
    row, col = edge_index[0], edge_index[1]
    e = row.shape[0]
    te = _choose_edge_tile(e)
    e_pad = _round_up(e, te)
    # TODO(synk): fuse this gather into the MLP kernel via scalar-prefetched indices.
    xs = jnp.pad(h2[row], ((0, e_pad - e), (0, 0)))
    xd = jnp.pad(h2[col], ((0, e_pad - e), (0, 0)))

    w1m = params["mlp_w1"]                      # (2C, 4C): rows [:C] hit x[row], [C:] x[col]
    w1s = _pad2(w1m[:c], c_pad, h_pad_dim).astype(_MXU_DTYPE)
    w1d = _pad2(w1m[c:], c_pad, h_pad_dim).astype(_MXU_DTYPE)
    mb1 = _pad2(params["mlp_b1"], 1, h_pad_dim)
    w2row = _pad2(params["mlp_w2"].T, 1, h_pad_dim)

    edge_score = edge_mlp(xs, xd, w1s, w1d, mb1, w2row, te)[:e]
    edge_score = edge_score + params["mlp_b2"].reshape(())     # b2 folded on host

    h2_real = h2[:n, :c].astype(jnp.float32)
    (c_ei, c_ea, c_ew), (f_ei, f_ea, f_ew) = split_graph(edge_index, edge_attr, edge_score, ratio)
    causal_x, c_ei, causal_batch, _ = relabel(h2_real, c_ei, batch)
    conf_x, f_ei, conf_batch, _ = relabel(h2_real, f_ei, batch)

    return (
        (causal_x, c_ei, c_ea, c_ew, causal_batch),
        (conf_x, f_ei, f_ea, f_ew, conf_batch),
        edge_score,
    )


# ----------------------------------------------------------------------------
if __name__ == "__main__":
    key = jax.random.PRNGKey(0)
    N, IN_CH, CH, RATIO = 16, 4, 8, 0.5

    # small synthetic graph: bidirectional ring, E = 32 edges
    src = jnp.arange(N, dtype=jnp.int32)
    dst = (src + 1) % N
    edge_index = jnp.stack(
        [jnp.concatenate([src, dst]), jnp.concatenate([dst, src])], axis=0
    )  # (2, 32)
    E = edge_index.shape[1]

    k_x, k_e, k_p = jax.random.split(key, 3)
    x = jax.random.normal(k_x, (N, IN_CH), jnp.float32)
    edge_attr = jax.random.uniform(k_e, (E, 1), jnp.float32, 0.5, 1.5)
    batch = jnp.zeros((N,), jnp.int32)

    params = init_params(k_p, IN_CH, CH)

    (causal, conf, edge_score) = causal_att_net_forward(
        params, x, edge_index, edge_attr, batch, RATIO
    )

    jax.block_until_ready(edge_score)
    jax.block_until_ready(causal[0])
    jax.block_until_ready(conf[0])

    assert edge_score.shape == (E,)
    assert causal[1].shape == (2, int(RATIO * E))
    assert bool(jnp.isfinite(edge_score).all())
    print("KERNEL_OK")
</pallas_src>

<mosaic_0001>
module attributes {stable_mosaic.version = 11 : i64} {
  func.func @xw_stacked_kernel(%arg0: i32, %arg1: memref<128x128xbf16, #tpu.memory_space<vmem>>, %arg2: memref<128x256xbf16, #tpu.memory_space<vmem>>, %arg3: memref<128x128xbf16, #tpu.memory_space<vmem>>, %arg4: memref<128x128xf32, #tpu.memory_space<vmem>>) attributes {dimension_semantics = [#tpu.dimension_semantics<parallel>], iteration_bounds = array<i64: 1>, scalar_prefetch = 0 : i64, scratch_operands = 0 : i64, tpu.core_type = #tpu.core_type<tc>, window_params = [{transform_indices = @transform_0, window_bounds = array<i64: 128, 128>}, {pipeline_mode = #tpu.pipeline_mode<synchronous>, transform_indices = @transform_1, window_bounds = array<i64: 128, 256>}, {transform_indices = @transform_2, window_bounds = array<i64: 128, 128>}, {transform_indices = @transform_3, window_bounds = array<i64: 128, 128>}]} {
    %c0 = arith.constant 0 : index
    %c0_0 = arith.constant 0 : index
    %0 = vector.load %arg1[%c0, %c0_0] : memref<128x128xbf16, #tpu.memory_space<vmem>>, vector<128x128xbf16>
    %c0_1 = arith.constant 0 : index
    %c0_2 = arith.constant 0 : index
    %1 = vector.load %arg2[%c0_1, %c0_2] : memref<128x256xbf16, #tpu.memory_space<vmem>>, vector<128x256xbf16>
    %cst = arith.constant dense<0.000000e+00> : vector<128x256xf32>
    %2 = tpu.matmul %0, %1, %cst {dimension_numbers = #tpu.dot_dimension_numbers<[1], [0], [0], [1], [0, 0, 1, 1], [], []>} : vector<128x128xbf16>, vector<128x256xbf16>, vector<128x256xf32> -> vector<128x256xf32>
    %3 = vector.extract_strided_slice %2 {offsets = [0, 0], sizes = [128, 128], strides = [1, 1]} : vector<128x256xf32> to vector<128x128xf32>
    %4 = arith.truncf %3 : vector<128x128xf32> to vector<128x128xbf16>
    %c0_3 = arith.constant 0 : index
    %c0_4 = arith.constant 0 : index
    %5 = vector.load %arg3[%c0_3, %c0_4] : memref<128x128xbf16, #tpu.memory_space<vmem>>, vector<128x128xbf16>
    tpu.vector_store %arg3[%c0_3, %c0_4], %4 {strides = array<i32>} : memref<128x128xbf16, #tpu.memory_space<vmem>>, vector<128x128xbf16>,
    %6 = vector.extract_strided_slice %2 {offsets = [0, 128], sizes = [128, 128], strides = [1, 1]} : vector<128x256xf32> to vector<128x128xf32>
    %c0_5 = arith.constant 0 : index
    %c0_6 = arith.constant 0 : index
    %7 = vector.load %arg4[%c0_5, %c0_6] : memref<128x128xf32, #tpu.memory_space<vmem>>, vector<128x128xf32>
    tpu.vector_store %arg4[%c0_5, %c0_6], %6 {strides = array<i32>} : memref<128x128xf32, #tpu.memory_space<vmem>>, vector<128x128xf32>,
    return
  }
  func.func @transform_0(%arg0: i32) -> (i32, i32) {
    %c0_i32 = arith.constant 0 : i32
    %c0_i32_0 = arith.constant 0 : i32
    return %arg0, %c0_i32 : i32, i32
  }
  func.func @transform_1(%arg0: i32) -> (i32, i32) {
    %c0_i32 = arith.constant 0 : i32
    %c0_i32_0 = arith.constant 0 : i32
    %c0_i32_1 = arith.constant 0 : i32
    return %c0_i32, %c0_i32_0 : i32, i32
  }
  func.func @transform_2(%arg0: i32) -> (i32, i32) {
    %c0_i32 = arith.constant 0 : i32
    %c0_i32_0 = arith.constant 0 : i32
    return %arg0, %c0_i32 : i32, i32
  }
  func.func @transform_3(%arg0: i32) -> (i32, i32) {
    %c0_i32 = arith.constant 0 : i32
    %c0_i32_0 = arith.constant 0 : i32
    return %arg0, %c0_i32 : i32, i32
  }
}

</mosaic_0001>

<bundles_post_ra>
// kernel: tpu_custom_call.1
= control target key start
LH: loop header
LB: loop body
LE: loop exit
PB: predicated region body
PF: predicated region fallthrough
CT: control target
= control target key end

     0   :  { %9 = vsyncpa [#allocation3], 0  ;;  %s807_s0 = inlined_call_operand.hbm [shape: bf16[128,128], index: 0, kind: input, shape index: {}]   ;;  %s808_s1 = inlined_call_operand.hbm [shape: bf16[128,256], index: 1, kind: input, shape index: {}]   ;;  %s809_s2 = inlined_call_operand.hbm [shape: bf16[128,128], index: 2, kind: output, shape index: {0}]   ;;  %s810_s3 = inlined_call_operand.hbm [shape: f32[128,128], index: 3, kind: output, shape index: {1}]  }
   0x1   :  { %10 = vsyncpa [#allocation6], 0 }
   0x2   :  { %11 = vsyncpa [#allocation4], 0 }
   0x3   :  { %12 = vsyncpa [#allocation9], 0  ;;  %s703_s12 = smov [#allocation2]   ;;  %s607_s16 = scalar_lea.hbm %s807_s0, 1024 }
   0x4   :  { %s18_s13 = sshll.u32 %s703_s12, 4  ;;  %p608_p0 = scmp.ne.s32.totalorder %s807_s0, %s607_s16  ;;  %s19_s13 = int_to_ptr.vmem [resolvable:$true] %s18_s13 }
   0x5   :  { %p611_p1 = scmp.lt.u32.totalorder %s607_s16, %s807_s0 }
   0x7   :  { %p613_p2 = pnand %p611_p1, %p608_p0 }
   0x9   :  { %616 = shalt.err (!%p613_p2)
}
   0xa   :  { %s617_s21 = scalar_lea.vmem %s19_s13, 1024  ;;  %p622_p4 = scmp.lt.s32.totalorder %s19_s13, %s19_s13 }
   0xb   :  { %p618_p3 = scmp.ne.s32.totalorder %s19_s13, %s617_s21  ;;  %p623_p5 = scmp.lt.s32.totalorder %s617_s21, %s617_s21 }
   0xd   :  { %p624_p6 = por %p623_p5, %p622_p4 }
   0xf   :  { %p625_p7 = pnand %p624_p6, %p618_p3 }
  0x11   :  { %628 = shalt.err (!%p625_p7)
}
  0x12   :  { %s704_s22 = smov 64   ;;  %s705_s23 = smov 4  }
  0x13   :  { %24 = dma.hbm_to_vmem [thread:$0]  %s807_s0, 1024, %s19_s13, [#allocation3], %s704_s22, %s704_s22, %s705_s23  }
  0x14   :  { %s706_s26 = smov [#allocation5]   ;;  %s629_s30 = scalar_lea.hbm %s808_s1, 2048 }
  0x15   :  { %s30_s27 = sshll.u32 %s706_s26, 4  ;;  %p630_p8 = scmp.ne.s32.totalorder %s808_s1, %s629_s30  ;;  %s31_s27 = int_to_ptr.vmem [resolvable:$true] %s30_s27 }
  0x16   :  { %p633_p9 = scmp.lt.u32.totalorder %s629_s30, %s808_s1 }
  0x18   :  { %p635_p10 = pnand %p633_p9, %p630_p8 }
  0x1a   :  { %638 = shalt.err (!%p635_p10)
}
  0x1b   :  { %s639_s8 = scalar_lea.vmem %s31_s27, 2048  ;;  %p644_p12 = scmp.lt.s32.totalorder %s31_s27, %s31_s27 }
  0x1c   :  { %p640_p11 = scmp.ne.s32.totalorder %s31_s27, %s639_s8  ;;  %p645_p13 = scmp.lt.s32.totalorder %s639_s8, %s639_s8 }
  0x1e   :  { %p646_p0 = por %p645_p13, %p644_p12 }
  0x20   :  { %p647_p1 = pnand %p646_p0, %p640_p11 }
  0x22   :  { %650 = shalt.err (!%p647_p1)
}
  0x23   :  { %s707_s0 = smov 128   ;;  %s708_s9 = smov 8  }
  0x24   :  { %36 = dma.hbm_to_vmem [thread:$0]  %s808_s1, 2048, %s31_s27, [#allocation6], %s707_s0, %s707_s0, %s708_s9  }
  0x25   :  { %695 = dma.done.wait [#allocation3], 1024  }
  0x26   :  { %696 = vsyncadd [#allocation3], 4294966272 }
  0x27   :  { %697 = dma.done.wait [#allocation6], 2048  }
  0x28   :  { %698 = vsyncadd [#allocation6], 4294965248  ;;  %v709_v0 = vmov 0   ;;  %v575_v1 = vld [vmem:[#allocation5 + $0x4] ss:$8 sps:$4 sm:$0xff]   ;;  %v603_v21 = vld [vmem:[#allocation2 + $0x10] sm:$0xff]  }
  0x29   :  { %236 = vmatprep.mubr.bf16.mxu0 %v709_v0  ;;  %276 = vmatprep.mubr.bf16.mxu1 %v709_v0  ;;  %v577_v2 = vld [vmem:[#allocation5] ss:$8 sps:$4 sm:$0xff]   ;;  %v578_v3 = vld [vmem:[#allocation5 + $0x14] ss:$8 sps:$4 sm:$0xff]   ;;  %v580_v4 = vld [vmem:[#allocation5 + $0x10] ss:$8 sps:$4 sm:$0xff]  }
  0x2a   :  { %204 = vmatprep.subr.bf16.mxu0 %v575_v1  ;;  %550 = vmatprep.subr.bf16.mxu1 %v575_v1  ;;  %v581_v5 = vld [vmem:[#allocation5 + $0x24] ss:$8 sps:$4 sm:$0xff]   ;;  %v583_v6 = vld [vmem:[#allocation5 + $0x20] ss:$8 sps:$4 sm:$0xff]   ;;  %v584_v7 = vld [vmem:[#allocation5 + $0x34] ss:$8 sps:$4 sm:$0xff]  }
  0x2b   :  { %205 = vmatpush1.bf16.msra.mxu0 %v577_v2  ;;  %558 = vmatpush1.bf16.msra.mxu1 %v577_v2  ;;  %v586_v8 = vld [vmem:[#allocation5 + $0x30] ss:$8 sps:$4 sm:$0xff]   ;;  %v587_v9 = vld [vmem:[#allocation5 + $0x44] ss:$8 sps:$4 sm:$0xff]   ;;  %v589_v10 = vld [vmem:[#allocation5 + $0x40] ss:$8 sps:$4 sm:$0xff]  }
  0x2c   :  { %206 = vmatprep.subr.bf16.mxu0 %v578_v3  ;;  %551 = vmatprep.subr.bf16.mxu1 %v578_v3  ;;  %v590_v11 = vld [vmem:[#allocation5 + $0x54] ss:$8 sps:$4 sm:$0xff]   ;;  %v592_v12 = vld [vmem:[#allocation5 + $0x50] ss:$8 sps:$4 sm:$0xff]   ;;  %v593_v13 = vld [vmem:[#allocation5 + $0x64] ss:$8 sps:$4 sm:$0xff]  }
  0x2d   :  { %v595_v14 = vld [vmem:[#allocation5 + $0x60] ss:$8 sps:$4 sm:$0xff]   ;;  %v596_v15 = vld [vmem:[#allocation5 + $0x74] ss:$8 sps:$4 sm:$0xff]   ;;  %v598_v16 = vld [vmem:[#allocation5 + $0x70] ss:$8 sps:$4 sm:$0xff]  }
  0x2e   :  { %v599_v17 = vld [vmem:[#allocation2] sm:$0xff]   ;;  %v601_v19 = vld [vmem:[#allocation2 + $0x8] sm:$0xff]   ;;  %v604_v22 = vld [vmem:[#allocation2 + $0x30] sm:$0xff]   ;;  %s710_s1 = smov [#allocation8]   ;;  %s711_s13 = smov [#allocation7]  }
  0x2f   :  { %207 = vmatpush1.bf16.msra.mxu0 %v580_v4  ;;  %559 = vmatpush1.bf16.msra.mxu1 %v580_v4  ;;  %v600_v18 = vld [vmem:[#allocation2 + $0x20] sm:$0xff]   ;;  %v602_v20 = vld [vmem:[#allocation2 + $0x28] sm:$0xff]   ;;  %v605_v23 = vld [vmem:[#allocation2 + $0x18] sm:$0xff]   ;;  %s430_s12 = sshll.u32 %s710_s1, 4  ;;  %s418_s14 = sshll.u32 %s711_s13, 4  ;;  %s431_s12 = int_to_ptr.vmem [resolvable:$true] %s430_s12  ;;  %s770_s14 = int_to_ptr.vmem [resolvable:$true] %s418_s14 }
  0x30   :  { %208 = vmatprep.subr.bf16.mxu0 %v581_v5  ;;  %552 = vmatprep.subr.bf16.mxu1 %v581_v5  ;;  %v606_v24 = vld [vmem:[#allocation2 + $0x38] sm:$0xff]   ;;  %s651_s15 = scalar_lea.vmem %s431_s12, 2048  ;;  %p656_p3 = scmp.lt.s32.totalorder %s431_s12, %s431_s12 }
  0x31   :  { %p652_p2 = scmp.ne.s32.totalorder %s431_s12, %s651_s15  ;;  %p657_p4 = scmp.lt.s32.totalorder %s651_s15, %s651_s15 }
  0x33   :  { %209 = vmatpush1.bf16.msra.mxu0 %v583_v6  ;;  %560 = vmatpush1.bf16.msra.mxu1 %v583_v6  ;;  %p658_p5 = por %p657_p4, %p656_p3 }
  0x34   :  { %210 = vmatprep.subr.bf16.mxu0 %v584_v7  ;;  %553 = vmatprep.subr.bf16.mxu1 %v584_v7 }
  0x35   :  { %p659_p6 = pnand %p658_p5, %p652_p2 }
  0x37   :  { %211 = vmatpush1.bf16.msra.mxu0 %v586_v8  ;;  %561 = vmatpush1.bf16.msra.mxu1 %v586_v8 }
  0x38   :  { %212 = vmatprep.subr.bf16.mxu0 %v587_v9  ;;  %554 = vmatprep.subr.bf16.mxu1 %v587_v9 }
  0x3b   :  { %213 = vmatpush1.bf16.msra.mxu0 %v589_v10  ;;  %562 = vmatpush1.bf16.msra.mxu1 %v589_v10 }
  0x3c   :  { %214 = vmatprep.subr.bf16.mxu0 %v590_v11  ;;  %555 = vmatprep.subr.bf16.mxu1 %v590_v11 }
  0x3f   :  { %215 = vmatpush1.bf16.msra.mxu0 %v592_v12  ;;  %563 = vmatpush1.bf16.msra.mxu1 %v592_v12 }
  0x40   :  { %216 = vmatprep.subr.bf16.mxu0 %v593_v13  ;;  %556 = vmatprep.subr.bf16.mxu1 %v593_v13 }
  0x43   :  { %217 = vmatpush1.bf16.msra.mxu0 %v595_v14  ;;  %564 = vmatpush1.bf16.msra.mxu1 %v595_v14 }
  0x44   :  { %218 = vmatprep.subr.bf16.mxu0 %v596_v15  ;;  %557 = vmatprep.subr.bf16.mxu1 %v596_v15 }
  0x47   :  { %219 = vmatpush1.bf16.msra.mxu0 %v598_v16  ;;  %565 = vmatpush1.bf16.msra.mxu1 %v598_v16 }
  0x4a   :  { %237 = vmatmul.mubr.bf16.vlgmr.msra.gmra.mrb[0].mxu0 %v599_v17  ;;  %277 = vmatmul.mubr.bf16.vlgmr.msra.gmra.mrb[0].mxu1 %v600_v18 }
  0x4b   :  { %246 = vmatprep.mubr.bf16.mxu0 %v709_v0  ;;  %286 = vmatprep.mubr.bf16.mxu1 %v709_v0 }
  0x52   :  { %247 = vmatmul.mubr.bf16.gmra.mrb[4].mxu0 %v601_v19  ;;  %287 = vmatmul.mubr.bf16.gmra.mrb[4].mxu1 %v602_v20 }
  0x53   :  { %256 = vmatprep.mubr.bf16.mxu0 %v709_v0  ;;  %296 = vmatprep.mubr.bf16.mxu1 %v709_v0 }
  0x5a   :  { %257 = vmatmul.mubr.bf16.gmra.mrb[8].mxu0 %v603_v21  ;;  %297 = vmatmul.mubr.bf16.gmra.mrb[8].mxu1 %v604_v22 }
  0x5b   :  { %266 = vmatprep.mubr.bf16.mxu0 %v709_v0  ;;  %306 = vmatprep.mubr.bf16.mxu1 %v709_v0 }
  0x62   :  { %267 = vmatmul.mubr.bf16.gmra.mrb[12].mxu0 %v605_v23  ;;  %307 = vmatmul.mubr.bf16.gmra.mrb[12].mxu1 %v606_v24 }
 0x11d   :  { %v238_v25 = vpop.f32.mrb[0].mxu0  ;;  %v278_v26 = vpop.f32.mrb[0].mxu1 }
 0x11e   :  { %v240_v27 = vpop.f32.mrb[1].mxu0  ;;  %v280_v28 = vpop.f32.mrb[1].mxu1 }
 0x11f   :  { %397 = vst [vmem:[#allocation8] sm:$0xff] %v240_v27  ;;  %405 = vst [vmem:[#allocation8 + $0x40] sm:$0xff] %v280_v28  ;;  %v242_v29 = vpop.f32.mrb[2].mxu0  ;;  %v282_v30 = vpop.f32.mrb[2].mxu1 }
 0x120   :  { %v506_v31 = vpack.c.bf16 %v242_v29, %v238_v25  ;;  %v526_v32 = vpack.c.bf16 %v282_v30, %v278_v26  ;;  %v244_v33 = vpop.f32.mrb[3].mxu0  ;;  %v284_v34 = vpop.f32.mrb[3].mxu1 }
 0x121   :  { %398 = vst [vmem:[#allocation8 + $0x8] sm:$0xff] %v244_v33  ;;  %406 = vst [vmem:[#allocation8 + $0x48] sm:$0xff] %v284_v34 }
 0x122   :  { %507 = vst [vmem:[#allocation7] sm:$0xff] %v506_v31   ;;  %546 = vst [vmem:[#allocation7 + $0x20] sm:$0xff] %v526_v32  }
 0x125   :  { %v248_v35 = vpop.f32.mrb[4].mxu0  ;;  %v288_v36 = vpop.f32.mrb[4].mxu1 }
 0x126   :  { %v250_v37 = vpop.f32.mrb[5].mxu0  ;;  %v290_v38 = vpop.f32.mrb[5].mxu1 }
 0x127   :  { %399 = vst [vmem:[#allocation8 + $0x10] sm:$0xff] %v250_v37  ;;  %407 = vst [vmem:[#allocation8 + $0x50] sm:$0xff] %v290_v38  ;;  %v252_v39 = vpop.f32.mrb[6].mxu0  ;;  %v292_v40 = vpop.f32.mrb[6].mxu1 }
 0x128   :  { %v511_v41 = vpack.c.bf16 %v252_v39, %v248_v35  ;;  %v531_v42 = vpack.c.bf16 %v292_v40, %v288_v36  ;;  %v254_v43 = vpop.f32.mrb[7].mxu0  ;;  %v294_v44 = vpop.f32.mrb[7].mxu1 }
 0x129   :  { %400 = vst [vmem:[#allocation8 + $0x18] sm:$0xff] %v254_v43  ;;  %408 = vst [vmem:[#allocation8 + $0x58] sm:$0xff] %v294_v44 }
 0x12a   :  { %543 = vst [vmem:[#allocation7 + $0x8] sm:$0xff] %v511_v41   ;;  %547 = vst [vmem:[#allocation7 + $0x28] sm:$0xff] %v531_v42  }
 0x12d   :  { %v258_v45 = vpop.f32.mrb[8].mxu0  ;;  %v298_v46 = vpop.f32.mrb[8].mxu1 }
 0x12e   :  { %v260_v47 = vpop.f32.mrb[9].mxu0  ;;  %v300_v48 = vpop.f32.mrb[9].mxu1 }
 0x12f   :  { %401 = vst [vmem:[#allocation8 + $0x20] sm:$0xff] %v260_v47  ;;  %409 = vst [vmem:[#allocation8 + $0x60] sm:$0xff] %v300_v48  ;;  %v262_v49 = vpop.f32.mrb[10].mxu0  ;;  %v302_v50 = vpop.f32.mrb[10].mxu1 }
 0x130   :  { %v516_v51 = vpack.c.bf16 %v262_v49, %v258_v45  ;;  %v536_v52 = vpack.c.bf16 %v302_v50, %v298_v46  ;;  %v264_v53 = vpop.f32.mrb[11].mxu0  ;;  %v304_v54 = vpop.f32.mrb[11].mxu1 }
 0x131   :  { %402 = vst [vmem:[#allocation8 + $0x28] sm:$0xff] %v264_v53  ;;  %410 = vst [vmem:[#allocation8 + $0x68] sm:$0xff] %v304_v54 }
 0x132   :  { %544 = vst [vmem:[#allocation7 + $0x10] sm:$0xff] %v516_v51   ;;  %548 = vst [vmem:[#allocation7 + $0x30] sm:$0xff] %v536_v52  }
 0x135   :  { %v268_v55 = vpop.f32.mrb[12].mxu0  ;;  %v308_v56 = vpop.f32.mrb[12].mxu1 }
 0x136   :  { %v270_v57 = vpop.f32.mrb[13].mxu0  ;;  %v310_v58 = vpop.f32.mrb[13].mxu1 }
 0x137   :  { %403 = vst [vmem:[#allocation8 + $0x30] sm:$0xff] %v270_v57  ;;  %411 = vst [vmem:[#allocation8 + $0x70] sm:$0xff] %v310_v58  ;;  %v272_v59 = vpop.f32.mrb[14].mxu0  ;;  %v312_v60 = vpop.f32.mrb[14].mxu1 }
 0x138   :  { %v521_v61 = vpack.c.bf16 %v272_v59, %v268_v55  ;;  %v541_v62 = vpack.c.bf16 %v312_v60, %v308_v56  ;;  %v274_v63 = vpop.f32.mrb[15].mxu0  ;;  %v314_v0 = vpop.f32.mrb[15].mxu1 }
 0x139   :  { %404 = vst [vmem:[#allocation8 + $0x38] sm:$0xff] %v274_v63  ;;  %412 = vst [vmem:[#allocation8 + $0x78] sm:$0xff] %v314_v0 }
 0x13a   :  { %545 = vst [vmem:[#allocation7 + $0x18] sm:$0xff] %v521_v61   ;;  %549 = vst [vmem:[#allocation7 + $0x38] sm:$0xff] %v541_v62  }
 0x13b   :  { %662 = shalt.err (!%p659_p6)
}
 0x13c   :  { %s663_s18 = scalar_lea.hbm %s810_s3, 2048 }
 0x13d   :  { %p664_p7 = scmp.ne.s32.totalorder %s810_s3, %s663_s18  ;;  %p667_p8 = scmp.lt.u32.totalorder %s663_s18, %s810_s3 }
 0x13f   :  { %p669_p9 = pnand %p667_p8, %p664_p7 }
 0x141   :  { %672 = shalt.err (!%p669_p9)
}
 0x142   :  { %436 = dma.vmem_to_hbm [thread:$0]  %s431_s12, 2048, %s810_s3, [#allocation9], %s707_s0, %s707_s0, %s708_s9  }
 0x143   :  { %s673_s27 = scalar_lea.vmem %s770_s14, 1024  ;;  %p678_p11 = scmp.lt.s32.totalorder %s770_s14, %s770_s14 }
 0x144   :  { %p674_p10 = scmp.ne.s32.totalorder %s770_s14, %s673_s27  ;;  %p679_p12 = scmp.lt.s32.totalorder %s673_s27, %s673_s27 }
 0x146   :  { %p680_p13 = por %p679_p12, %p678_p11 }
 0x148   :  { %p681_p0 = pnand %p680_p13, %p674_p10 }
 0x14a   :  { %684 = shalt.err (!%p681_p0)
}
 0x14b   :  { %s685_s30 = scalar_lea.hbm %s809_s2, 1024 }
 0x14c   :  { %p686_p1 = scmp.ne.s32.totalorder %s809_s2, %s685_s30  ;;  %p689_p2 = scmp.lt.u32.totalorder %s685_s30, %s809_s2 }
 0x14e   :  { %p691_p3 = pnand %p689_p2, %p686_p1 }
 0x150   :  { %694 = shalt.err (!%p691_p3)
}
 0x151   :  { %424 = dma.vmem_to_hbm [thread:$0]  %s770_s14, 1024, %s809_s2, [#allocation4], %s704_s22, %s704_s22, %s705_s23  }
 0x152   :  { %699 = dma.done.wait [#allocation4], 1024  }
 0x153   :  { %700 = vsyncadd [#allocation4], 4294966272 }
 0x154   :  { %701 = dma.done.wait [#allocation9], 2048  }
 0x155   :  { %702 = vsyncadd [#allocation9], 4294965248 }
 0x156   :  { %443 = vsyncpa [#allocation3], 1 }
 0x157   :  { %444 = vsyncpa [#allocation6], 1 }
 0x158   :  { %445 = vsyncpa [#allocation4], 1 }
 0x159   :  { %446 = vsyncpa [#allocation9], 1 }

</bundles_post_ra>
